<compile_context>
chip_gen: v7x
topology: tpu7x:2x2x1
jax: 0.10.0
libtpu: 0.0.40
codegen_flags: <defaults>
</compile_context>

<pallas_src>
import functools

import jax
import jax.numpy as jnp
from jax.experimental import pallas as pl
from jax.experimental.pallas import tpu as pltpu


def _round_up(x, m):
    return (x + m - 1) // m * m


def _cdiv(a, b):
    return (a + b - 1) // b


def _vmem_capacity_bytes():
    """Per-TensorCore VMEM capacity; conservative v7x default on failure."""
    try:
        info = pltpu.get_tpu_info()
        cap = getattr(info, "vmem_capacity_bytes", None)
        if cap:
            return int(cap)
    except Exception:
        pass
    return 64 * 1024 * 1024


def _disparity_group(max_disp):
    """Disparity-group size TD: a multiple of 8 that divides 128 (so that
    round_up(max_disp, TD) <= round_up(max_disp, 128) = Dpad)."""
    for td in (8, 16, 32):
        if max_disp <= td:
            return td
    return 32


def _pick_row_tile(b, c, h, wp, dpad, td, itemsize, vmem_cap):
    """Pick the h-row tile TH (multiple of 8) from a chip-aware VMEM budget.

    Accounts for the double-buffered left/right/out blocks plus the in-kernel
    right window copy and small f32 temporaries.
    """
    budget = vmem_cap // 3
    per_row = itemsize * (2 * (c * wp + c * (wp + dpad) + td * wp)
                          + c * (wp + td)) + 8 * wp
    th = budget // per_row
    th = max(8, min((int(th) // 8) * 8, 256, _round_up(h, 8)))
    # Keep >= 4 parallel grid steps (2 TCs on v7x, plus pipeline depth) even
    # at batch 1-2 / small h, as long as TH can shrink.
    while th > 8 and b * _cdiv(h, th) < 4:
        th -= 8
    return th


def _cost_volume_kernel(left_ref, right_ref, out_ref, *, dpad, td, num_groups,
                        inv_c):
    # left_ref  : (1, c, TH, Wp)         VMEM block
    # right_ref : (1, c, TH, Wp + dpad)  VMEM block (left halo of dpad zero lanes)
    # out_ref   : (1, td, TH, Wp)        VMEM block for this disparity group
    left = left_ref[0]                     # input dtype; no blanket f32 upcast
    c, th, wp = left.shape

    # One windowed load per disparity group.  The window spans columns
    # [dpad - (group+1)*td, dpad - group*td + wp) of the haloed right block,
    # so every disparity in the group becomes a *static* lane slice of it.
    if num_groups == 1:
        start = dpad - td                  # fully static (common small-max_disp case)
    else:
        start = dpad - (pl.program_id(2) + 1) * td
        start = pl.multiple_of(start, td)
    window = right_ref[0, :, :, pl.ds(start, wp + td)]   # (c, TH, Wp + td)

    for j in range(td):                    # static unroll, constant-amount shifts
        # global disparity i = group*td + j ; window col (td - j + w) == Rpad col (dpad - i + w)
        shifted = window[:, :, td - j: td - j + wp]        # (c, TH, Wp)
        # multiply in the input dtype, accumulate the channel sum in f32
        corr = jnp.sum(left * shifted, axis=0, dtype=jnp.float32) * inv_c
        out_ref[0, j] = corr.astype(out_ref.dtype)


def cost_volume(left_feature, right_feature, max_disp):
    """Correlation cost volume:
    out[b, i, h, w] = mean_c(L[b,c,h,w] * R[b,c,h,w-i]) for w >= i, else 0."""
    b, c, h, w = left_feature.shape
    dtype = left_feature.dtype
    itemsize = jnp.dtype(dtype).itemsize

    td = _disparity_group(max_disp)          # disparities per grid step
    ndg = _cdiv(max_disp, td)                # disparity groups (grid axis 2)
    dpad = _round_up(max_disp, 128)          # 128-lane-aligned zero halo (>= ndg*td)
    wp = _round_up(w, 128)                   # lane-dense output stores

    vmem_cap = _vmem_capacity_bytes()
    th = _pick_row_tile(b, c, h, wp, dpad, td, itemsize, vmem_cap)
    hp = _round_up(h, th)

    lf = left_feature
    if hp != h or wp != w:
        lf = jnp.pad(lf, ((0, 0), (0, 0), (0, hp - h), (0, wp - w)))
    # Right gets the left halo (wrapper-side, 128-aligned) + the same h/w padding.
    rf = jnp.pad(right_feature,
                 ((0, 0), (0, 0), (0, hp - h), (dpad, wp - w)))

    kernel = functools.partial(_cost_volume_kernel, dpad=dpad, td=td,
                               num_groups=ndg, inv_c=1.0 / c)

    out = pl.pallas_call(
        kernel,
        out_shape=jax.ShapeDtypeStruct((b, ndg * td, hp, wp), dtype),
        grid=(b, hp // th, ndg),
        in_specs=[
            pl.BlockSpec((1, c, th, wp), lambda bi, hi, di: (bi, 0, hi, 0)),
            pl.BlockSpec((1, c, th, wp + dpad), lambda bi, hi, di: (bi, 0, hi, 0)),
        ],
        out_specs=pl.BlockSpec((1, td, th, wp), lambda bi, hi, di: (bi, di, hi, 0)),
        compiler_params=pltpu.CompilerParams(
            dimension_semantics=("parallel", "parallel", "arbitrary"),
            vmem_limit_bytes=min(3 * vmem_cap // 4, 112 * 1024 * 1024),
        ),
    )(lf, rf)

    return out[:, :max_disp, :h, :w]


def cost_volume_ref(left, right, max_disp):
    """Pure-JAX reference mirroring the PyTorch loop."""
    outs = []
    for i in range(max_disp):
        if i > 0:
            v = (left[:, :, :, i:] * right[:, :, :, :-i]).mean(axis=1)
            v = jnp.pad(v, ((0, 0), (0, 0), (i, 0)))
        else:
            v = (left * right).mean(axis=1)
        outs.append(v)
    return jnp.stack(outs, axis=1)


if __name__ == "__main__":
    key = jax.random.PRNGKey(0)
    k1, k2 = jax.random.split(key)

    b, c, h, w = 2, 4, 16, 16
    max_disp = 4

    left = jax.random.normal(k1, (b, c, h, w), dtype=jnp.float32)
    right = jax.random.normal(k2, (b, c, h, w), dtype=jnp.float32)

    out = cost_volume(left, right, max_disp)
    jax.block_until_ready(out)

    ref = cost_volume_ref(left, right, max_disp)
    assert out.shape == (b, max_disp, h, w), out.shape
    tol = 1e-5 if out.dtype == jnp.float32 else 2e-2   # dtype-aware tolerance
    assert jnp.allclose(out, ref, atol=tol, rtol=tol), "mismatch vs reference"

    print("KERNEL_OK")
</pallas_src>

<mosaic_0001>
module attributes {stable_mosaic.version = 11 : i64} {
  func.func @_cost_volume_kernel(%arg0: i32, %arg1: i32, %arg2: i32, %arg3: memref<1x4x8x128xf32, #tpu.memory_space<vmem>>, %arg4: memref<1x4x8x256xf32, #tpu.memory_space<vmem>>, %arg5: memref<1x8x8x128xf32, #tpu.memory_space<vmem>>) attributes {dimension_semantics = [#tpu.dimension_semantics<parallel>, #tpu.dimension_semantics<parallel>, #tpu.dimension_semantics<arbitrary>], iteration_bounds = array<i64: 2, 2, 1>, scalar_prefetch = 0 : i64, scratch_operands = 0 : i64, tpu.core_type = #tpu.core_type<tc>, window_params = [{transform_indices = @transform_0, window_bounds = array<i64: 1, 4, 8, 128>}, {transform_indices = @transform_1, window_bounds = array<i64: 1, 4, 8, 256>}, {transform_indices = @transform_2, window_bounds = array<i64: 1, 8, 8, 128>}]} {
    %c0 = arith.constant 0 : index
    %c0_0 = arith.constant 0 : index
    %c0_1 = arith.constant 0 : index
    %c0_2 = arith.constant 0 : index
    %0 = vector.load %arg3[%c0, %c0_0, %c0_1, %c0_2] : memref<1x4x8x128xf32, #tpu.memory_space<vmem>>, vector<1x4x8x128xf32>
    %1 = vector.shape_cast %0 : vector<1x4x8x128xf32> to vector<4x8x128xf32>
    %c0_3 = arith.constant 0 : index
    %c0_4 = arith.constant 0 : index
    %c0_5 = arith.constant 0 : index
    %c120 = arith.constant 120 : index
    %2 = vector.load %arg4[%c0_3, %c0_4, %c0_5, %c120] : memref<1x4x8x256xf32, #tpu.memory_space<vmem>>, vector<1x4x8x136xf32>
    %3 = vector.shape_cast %2 : vector<1x4x8x136xf32> to vector<4x8x136xf32>
    %4 = vector.extract_strided_slice %3 {offsets = [0, 0, 8], sizes = [4, 8, 128], strides = [1, 1, 1]} : vector<4x8x136xf32> to vector<4x8x128xf32>
    %5 = arith.mulf %1, %4 : vector<4x8x128xf32>
    %cst = arith.constant dense<0.000000e+00> : vector<8x128xf32>
    %6 = vector.multi_reduction <add>, %5, %cst [0] : vector<4x8x128xf32> to vector<8x128xf32>
    %cst_6 = arith.constant 2.500000e-01 : f32
    %7 = vector.broadcast %cst_6 : f32 to vector<8x128xf32>
    %8 = arith.mulf %6, %7 : vector<8x128xf32>
    %c0_7 = arith.constant 0 : index
    %c0_8 = arith.constant 0 : index
    %c0_9 = arith.constant 0 : index
    %c0_10 = arith.constant 0 : index
    %9 = vector.load %arg5[%c0_7, %c0_8, %c0_9, %c0_10] : memref<1x8x8x128xf32, #tpu.memory_space<vmem>>, vector<1x1x8x128xf32>
    %10 = vector.shape_cast %9 : vector<1x1x8x128xf32> to vector<8x128xf32>
    %11 = vector.shape_cast %8 : vector<8x128xf32> to vector<1x1x8x128xf32>
    tpu.vector_store %arg5[%c0_7, %c0_8, %c0_9, %c0_10], %11 {strides = array<i32>} : memref<1x8x8x128xf32, #tpu.memory_space<vmem>>, vector<1x1x8x128xf32>,
    %12 = vector.extract_strided_slice %3 {offsets = [0, 0, 7], sizes = [4, 8, 128], strides = [1, 1, 1]} : vector<4x8x136xf32> to vector<4x8x128xf32>
    %13 = arith.mulf %1, %12 : vector<4x8x128xf32>
    %cst_11 = arith.constant dense<0.000000e+00> : vector<8x128xf32>
    %14 = vector.multi_reduction <add>, %13, %cst_11 [0] : vector<4x8x128xf32> to vector<8x128xf32>
    %cst_12 = arith.constant 2.500000e-01 : f32
    %15 = vector.broadcast %cst_12 : f32 to vector<8x128xf32>
    %16 = arith.mulf %14, %15 : vector<8x128xf32>
    %c0_13 = arith.constant 0 : index
    %c1 = arith.constant 1 : index
    %c0_14 = arith.constant 0 : index
    %c0_15 = arith.constant 0 : index
    %17 = vector.load %arg5[%c0_13, %c1, %c0_14, %c0_15] : memref<1x8x8x128xf32, #tpu.memory_space<vmem>>, vector<1x1x8x128xf32>
    %18 = vector.shape_cast %17 : vector<1x1x8x128xf32> to vector<8x128xf32>
    %19 = vector.shape_cast %16 : vector<8x128xf32> to vector<1x1x8x128xf32>
    tpu.vector_store %arg5[%c0_13, %c1, %c0_14, %c0_15], %19 {strides = array<i32>} : memref<1x8x8x128xf32, #tpu.memory_space<vmem>>, vector<1x1x8x128xf32>,
    %20 = vector.extract_strided_slice %3 {offsets = [0, 0, 6], sizes = [4, 8, 128], strides = [1, 1, 1]} : vector<4x8x136xf32> to vector<4x8x128xf32>
    %21 = arith.mulf %1, %20 : vector<4x8x128xf32>
    %cst_16 = arith.constant dense<0.000000e+00> : vector<8x128xf32>
    %22 = vector.multi_reduction <add>, %21, %cst_16 [0] : vector<4x8x128xf32> to vector<8x128xf32>
    %cst_17 = arith.constant 2.500000e-01 : f32
    %23 = vector.broadcast %cst_17 : f32 to vector<8x128xf32>
    %24 = arith.mulf %22, %23 : vector<8x128xf32>
    %c0_18 = arith.constant 0 : index
    %c2 = arith.constant 2 : index
    %c0_19 = arith.constant 0 : index
    %c0_20 = arith.constant 0 : index
    %25 = vector.load %arg5[%c0_18, %c2, %c0_19, %c0_20] : memref<1x8x8x128xf32, #tpu.memory_space<vmem>>, vector<1x1x8x128xf32>
    %26 = vector.shape_cast %25 : vector<1x1x8x128xf32> to vector<8x128xf32>
    %27 = vector.shape_cast %24 : vector<8x128xf32> to vector<1x1x8x128xf32>
    tpu.vector_store %arg5[%c0_18, %c2, %c0_19, %c0_20], %27 {strides = array<i32>} : memref<1x8x8x128xf32, #tpu.memory_space<vmem>>, vector<1x1x8x128xf32>,
    %28 = vector.extract_strided_slice %3 {offsets = [0, 0, 5], sizes = [4, 8, 128], strides = [1, 1, 1]} : vector<4x8x136xf32> to vector<4x8x128xf32>
    %29 = arith.mulf %1, %28 : vector<4x8x128xf32>
    %cst_21 = arith.constant dense<0.000000e+00> : vector<8x128xf32>
    %30 = vector.multi_reduction <add>, %29, %cst_21 [0] : vector<4x8x128xf32> to vector<8x128xf32>
    %cst_22 = arith.constant 2.500000e-01 : f32
    %31 = vector.broadcast %cst_22 : f32 to vector<8x128xf32>
    %32 = arith.mulf %30, %31 : vector<8x128xf32>
    %c0_23 = arith.constant 0 : index
    %c3 = arith.constant 3 : index
    %c0_24 = arith.constant 0 : index
    %c0_25 = arith.constant 0 : index
    %33 = vector.load %arg5[%c0_23, %c3, %c0_24, %c0_25] : memref<1x8x8x128xf32, #tpu.memory_space<vmem>>, vector<1x1x8x128xf32>
    %34 = vector.shape_cast %33 : vector<1x1x8x128xf32> to vector<8x128xf32>
    %35 = vector.shape_cast %32 : vector<8x128xf32> to vector<1x1x8x128xf32>
    tpu.vector_store %arg5[%c0_23, %c3, %c0_24, %c0_25], %35 {strides = array<i32>} : memref<1x8x8x128xf32, #tpu.memory_space<vmem>>, vector<1x1x8x128xf32>,
    %36 = vector.extract_strided_slice %3 {offsets = [0, 0, 4], sizes = [4, 8, 128], strides = [1, 1, 1]} : vector<4x8x136xf32> to vector<4x8x128xf32>
    %37 = arith.mulf %1, %36 : vector<4x8x128xf32>
    %cst_26 = arith.constant dense<0.000000e+00> : vector<8x128xf32>
    %38 = vector.multi_reduction <add>, %37, %cst_26 [0] : vector<4x8x128xf32> to vector<8x128xf32>
    %cst_27 = arith.constant 2.500000e-01 : f32
    %39 = vector.broadcast %cst_27 : f32 to vector<8x128xf32>
    %40 = arith.mulf %38, %39 : vector<8x128xf32>
    %c0_28 = arith.constant 0 : index
    %c4 = arith.constant 4 : index
    %c0_29 = arith.constant 0 : index
    %c0_30 = arith.constant 0 : index
    %41 = vector.load %arg5[%c0_28, %c4, %c0_29, %c0_30] : memref<1x8x8x128xf32, #tpu.memory_space<vmem>>, vector<1x1x8x128xf32>
    %42 = vector.shape_cast %41 : vector<1x1x8x128xf32> to vector<8x128xf32>
    %43 = vector.shape_cast %40 : vector<8x128xf32> to vector<1x1x8x128xf32>
    tpu.vector_store %arg5[%c0_28, %c4, %c0_29, %c0_30], %43 {strides = array<i32>} : memref<1x8x8x128xf32, #tpu.memory_space<vmem>>, vector<1x1x8x128xf32>,
    %44 = vector.extract_strided_slice %3 {offsets = [0, 0, 3], sizes = [4, 8, 128], strides = [1, 1, 1]} : vector<4x8x136xf32> to vector<4x8x128xf32>
    %45 = arith.mulf %1, %44 : vector<4x8x128xf32>
    %cst_31 = arith.constant dense<0.000000e+00> : vector<8x128xf32>
    %46 = vector.multi_reduction <add>, %45, %cst_31 [0] : vector<4x8x128xf32> to vector<8x128xf32>
    %cst_32 = arith.constant 2.500000e-01 : f32
    %47 = vector.broadcast %cst_32 : f32 to vector<8x128xf32>
    %48 = arith.mulf %46, %47 : vector<8x128xf32>
    %c0_33 = arith.constant 0 : index
    %c5 = arith.constant 5 : index
    %c0_34 = arith.constant 0 : index
    %c0_35 = arith.constant 0 : index
    %49 = vector.load %arg5[%c0_33, %c5, %c0_34, %c0_35] : memref<1x8x8x128xf32, #tpu.memory_space<vmem>>, vector<1x1x8x128xf32>
    %50 = vector.shape_cast %49 : vector<1x1x8x128xf32> to vector<8x128xf32>
    %51 = vector.shape_cast %48 : vector<8x128xf32> to vector<1x1x8x128xf32>
    tpu.vector_store %arg5[%c0_33, %c5, %c0_34, %c0_35], %51 {strides = array<i32>} : memref<1x8x8x128xf32, #tpu.memory_space<vmem>>, vector<1x1x8x128xf32>,
    %52 = vector.extract_strided_slice %3 {offsets = [0, 0, 2], sizes = [4, 8, 128], strides = [1, 1, 1]} : vector<4x8x136xf32> to vector<4x8x128xf32>
    %53 = arith.mulf %1, %52 : vector<4x8x128xf32>
    %cst_36 = arith.constant dense<0.000000e+00> : vector<8x128xf32>
    %54 = vector.multi_reduction <add>, %53, %cst_36 [0] : vector<4x8x128xf32> to vector<8x128xf32>
    %cst_37 = arith.constant 2.500000e-01 : f32
    %55 = vector.broadcast %cst_37 : f32 to vector<8x128xf32>
    %56 = arith.mulf %54, %55 : vector<8x128xf32>
    %c0_38 = arith.constant 0 : index
    %c6 = arith.constant 6 : index
    %c0_39 = arith.constant 0 : index
    %c0_40 = arith.constant 0 : index
    %57 = vector.load %arg5[%c0_38, %c6, %c0_39, %c0_40] : memref<1x8x8x128xf32, #tpu.memory_space<vmem>>, vector<1x1x8x128xf32>
    %58 = vector.shape_cast %57 : vector<1x1x8x128xf32> to vector<8x128xf32>
    %59 = vector.shape_cast %56 : vector<8x128xf32> to vector<1x1x8x128xf32>
    tpu.vector_store %arg5[%c0_38, %c6, %c0_39, %c0_40], %59 {strides = array<i32>} : memref<1x8x8x128xf32, #tpu.memory_space<vmem>>, vector<1x1x8x128xf32>,
    %60 = vector.extract_strided_slice %3 {offsets = [0, 0, 1], sizes = [4, 8, 128], strides = [1, 1, 1]} : vector<4x8x136xf32> to vector<4x8x128xf32>
    %61 = arith.mulf %1, %60 : vector<4x8x128xf32>
    %cst_41 = arith.constant dense<0.000000e+00> : vector<8x128xf32>
    %62 = vector.multi_reduction <add>, %61, %cst_41 [0] : vector<4x8x128xf32> to vector<8x128xf32>
    %cst_42 = arith.constant 2.500000e-01 : f32
    %63 = vector.broadcast %cst_42 : f32 to vector<8x128xf32>
    %64 = arith.mulf %62, %63 : vector<8x128xf32>
    %c0_43 = arith.constant 0 : index
    %c7 = arith.constant 7 : index
    %c0_44 = arith.constant 0 : index
    %c0_45 = arith.constant 0 : index
    %65 = vector.load %arg5[%c0_43, %c7, %c0_44, %c0_45] : memref<1x8x8x128xf32, #tpu.memory_space<vmem>>, vector<1x1x8x128xf32>
    %66 = vector.shape_cast %65 : vector<1x1x8x128xf32> to vector<8x128xf32>
    %67 = vector.shape_cast %64 : vector<8x128xf32> to vector<1x1x8x128xf32>
    tpu.vector_store %arg5[%c0_43, %c7, %c0_44, %c0_45], %67 {strides = array<i32>} : memref<1x8x8x128xf32, #tpu.memory_space<vmem>>, vector<1x1x8x128xf32>,
    return
  }
  func.func @transform_0(%arg0: i32, %arg1: i32, %arg2: i32) -> (i32, i32, i32, i32) {
    %c0_i32 = arith.constant 0 : i32
    %c0_i32_0 = arith.constant 0 : i32
    %c0_i32_1 = arith.constant 0 : i32
    return %arg0, %c0_i32, %arg1, %c0_i32_0 : i32, i32, i32, i32
  }
  func.func @transform_1(%arg0: i32, %arg1: i32, %arg2: i32) -> (i32, i32, i32, i32) {
    %c0_i32 = arith.constant 0 : i32
    %c0_i32_0 = arith.constant 0 : i32
    %c0_i32_1 = arith.constant 0 : i32
    return %arg0, %c0_i32, %arg1, %c0_i32_0 : i32, i32, i32, i32
  }
  func.func @transform_2(%arg0: i32, %arg1: i32, %arg2: i32) -> (i32, i32, i32, i32) {
    %c0_i32 = arith.constant 0 : i32
    %c0_i32_0 = arith.constant 0 : i32
    return %arg0, %arg2, %arg1, %c0_i32 : i32, i32, i32, i32
  }
}

</mosaic_0001>

<bundles_post_ra>
// kernel: tpu_custom_call.1
= control target key start
LH: loop header
LB: loop body
LE: loop exit
PB: predicated region body
PF: predicated region fallthrough
CT: control target
= control target key end

     0   :  { %s1325_s0 = inlined_call_operand.hbm [shape: f32[2,4,16,128], index: 0, kind: input, shape index: {}]   ;;  %s1326_s1 = inlined_call_operand.hbm [shape: f32[2,4,16,256], index: 1, kind: input, shape index: {}]   ;;  %s1327_s2 = inlined_call_operand.hbm [shape: f32[2,8,16,128], index: 2, kind: output, shape index: {}]  }
   0x1   :  { %1332 = sst [smem:[#allocation14_spill]] %s1325_s0 }
   0x2   :  { %7 = vsyncpa [#allocation3], 0 }
   0x3   :  { %9 = vsyncpa [#allocation3 + $0x1], 0 }
   0x4   :  { %10 = vsyncpa [#allocation6], 0 }
   0x5   :  { %12 = vsyncpa [#allocation6 + $0x1], 0 }
   0x6   :  { %13 = vsyncpa [#allocation4], 0 }
   0x7   :  { %15 = vsyncpa [#allocation4 + $0x1], 0  ;;  %s966_s9 = smov 0   ;;  %s968_s10 = smov 0  }
   0x8   :  { %s970_s11 = smov 0   ;;  %s972_s12 = smov 0  }
   0x9   :  { %s974_s13 = smov 0   ;;  %s976_s14 = smov 0  }
   0xa   :  { %s978_s15 = smov 0   ;;  %s980_s16 = smov 0  }
   0xb LB: > { %s644_s17 = sadd.s32 4294967295, %s931_s16   ;;  %s645_s18 = sadd.s32 4294967294, %s931_s16   ;;  %s931_s16 = sphi %s980_s16, %s21_s16   ;;  %s927_s15 = sphi %s978_s15, %s1355_s15   ;;  %s923_s14 = sphi %s976_s14, %s1354_s14   ;;  %s919_s13 = sphi %s974_s13, %s1353_s13   ;;  %s915_s12 = sphi %s972_s12, %s1352_s12   ;;  %s911_s11 = sphi %s970_s11, %s1351_s11   ;;  %s907_s10 = sphi %s968_s10, %s1350_s10   ;;  %s903_s9 = sphi %s966_s9, %s1349_s9  }
   0xc   : > { %s36_s19 = sadd.s32 1, %s923_s14  ;;  %s40_s20 = sadd.s32 1, %s927_s15 }
   0xd   : > { %p38_p0 = scmp.ge.s32.totalorder %s36_s19, 2  ;;  %s49_s21 = sadd.s32 1, %s911_s11 }
   0xe   : > { %p56_p1 = scmp.ne.s32.totalorder %s911_s11, %s907_s10  ;;  %p57_p2 = scmp.eq.s32.totalorder %s931_s16, 0 }
   0xf   : > { %s1357_s19 = smov (%p38_p0, %s36_s19), 0  ;;  %s1359_s20 = smov (!%p38_p0, %s40_s20), %s927_s15 }
  0x10   : > { %1333 = sst [smem:[#allocation11_spill]] %s1357_s19  ;;  %s45_s22 = ssub.s32 %s923_s14, %s1357_s19 }
  0x11   : > { %p1019_p3 = por %p57_p2, %p56_p1  ;;  %p42_p4 = scmp.ge.s32.totalorder %s1359_s20, 2 }
  0x12   : > { %p62_p5 = scmp.ne.s32.totalorder %s907_s10, %s903_s9  ;;  %p63_p6 = scmp.eq.s32.totalorder %s644_s17, 0 }
  0x13   : > { %p118_p7 = scmp.eq.s32.totalorder %s644_s17, 3  ;;  %s1361_s20 = smov (%p42_p4, %s1359_s20), 0 }
  0x14   : > { %1335 = sst [smem:[#allocation12_spill]] %s1361_s20  ;;  %p1027_p8 = por %p63_p6, %p62_p5 }
  0x15   : > { %p1031_p9 = por %p118_p7, %p56_p1  ;;  %s44_s26 = ssub.s32 %s927_s15, %s1361_s20 }
  0x16   : > { %s1336_s24 = scalar_select %p1027_p8, 1, 0 }
  0x17   : > { %s1337_s25 = scalar_select %p1031_p9, 1, 0 }
  0x18   : > { %p124_p10 = scmp.eq.s32.totalorder %s645_s18, 3  ;;  %s46_s27 = sor.u32 %s45_s22, %s44_s26 }
  0x19   : > { %p47_p11 = scmp.eq.s32.totalorder %s46_s27, 0  ;;  %p688_p13 = scmp.lt.s32.totalorder %s931_s16, 4 }
  0x1a   : > { %p1037_p12 = por %p124_p10, %p62_p5  ;;  %s1043_s29 = sand.u32 1, %s911_s11  }
  0x1b   : > { %s1046_s30 = scalar_select %p47_p11, %s911_s11, %s49_s21  }
  0x1c   : > { %s1338_s28 = scalar_select %p1037_p12, 1, 0 }
  0x1d   : > { %1339 = sst [smem:[#allocation13_spill]] %s1046_s30  ;;  %s648_s3 = sshll.u32 %s1043_s29, 5 }
  0x1e   : > { %s649_s4 = sshll.u32 %s927_s15, 3  ;;  %s148_s6 = scalar_lea.vmem [#allocation2], %s648_s3 }
  0x1f   : > { %s153_s5 = sadd.s32 %s923_s14, %s649_s4  ;;  %s156_s7 = sshll.u32 %s148_s6, 4  ;;  %s1051_s7 = int_to_ptr.vmem [resolvable:$true] %s156_s7 }
  0x20   : > { %s650_s8 = sshll.u32 %s153_s5, 7  ;;  %s1340_s0 = sld [smem:[#allocation14_spill]] }
  0x21   : > { %p1060_p0 = pnand %p688_p13, %p1019_p3  ;;  %s145_s26 = scalar_lea.sflag [#allocation3], %s1043_s29 }
  0x23   : > { %p771_p2 = pneg %p1060_p0 }
  0x26   : > { %s1056_s22 = scalar_lea.hbm %s1340_s0, %s650_s8  ;;  %s774_s4 = scalar_lea.hbm %s1340_s0, 2048 }
  0x27   : > { %s769_s27 = scalar_lea.hbm %s1056_s22, 512  ;;  %p775_p3 = scmp.lt.u32.totalorder %s1056_s22, %s1340_s0 }
  0x28   : > { %p770_p1 = scmp.ne.s32.totalorder %s1056_s22, %s769_s27  ;;  %p776_p6 = scmp.lt.u32.totalorder %s774_s4, %s769_s27 }
  0x29   : > { %p778_p10 = scmp.lt.u32.totalorder %s769_s27, %s1056_s22 }
  0x2a   : > { %p772_p4 = pnand %p771_p2, %p770_p1  ;;  %p777_p7 = por %p776_p6, %p775_p3 }
  0x2c   : > { %p773_p5 = pneg %p772_p4  ;;  %p779_p11 = por %p778_p10, %p777_p7 }
  0x2e   : > { %p780_p13 = pnand %p779_p11, %p773_p5 }
  0x30   : > { %783 = shalt.err (!%p780_p13)
}
  0x31   : > { %s784_s8 = scalar_lea.vmem %s1051_s7, 512  ;;  %s933_s17 = smov [#allocation2]  }
  0x32   : > { %p785_p1 = scmp.ne.s32.totalorder %s1051_s7, %s784_s8  ;;  %s789_s18 = sshll.u32 %s933_s17, 4  ;;  %s790_s18 = int_to_ptr.vmem [resolvable:$false] %s789_s18 }
  0x33   : > { %s791_s23 = scalar_lea.vmem %s790_s18, 1024  ;;  %p792_p9 = scmp.lt.s32.totalorder %s1051_s7, %s790_s18 }
  0x34   : > { %p787_p4 = pnand %p785_p1, %p771_p2  ;;  %p793_p3 = scmp.lt.s32.totalorder %s791_s23, %s784_s8 }
  0x36   : > { %p788_p12 = pneg %p787_p4  ;;  %p794_p6 = por %p793_p3, %p792_p9 }
  0x38   : > { %p795_p7 = pnand %p794_p6, %p788_p12 }
  0x3a   : > { %798 = shalt.err (!%p795_p7)
}
  0x3b   : > { %s934_s27 = smov 256   ;;  %s935_s3 = smov 128  }
  0x3c   : > { %s936_s4 = smov 8   ;;  %p655_p9 = scmp.ge.s32.totalorder %s931_s16, 1 }
  0x3d   : > { %680 = dma.hbm_to_vmem [thread:$0]  (!%p1060_p0), %s1056_s22, 512, %s1051_s7, %s145_s26, %s934_s27, %s935_s3, %s936_s4  }
  0x3e   : > { %p187_p12 = scmp.lt.s32.totalorder %s931_s16, 5  ;;  %s651_s5 = sshll.u32 %s1043_s29, 6 }
  0x3f   : > { %s652_s8 = sshll.u32 %s923_s14, 1  ;;  %s653_s17 = sshll.u32 %s927_s15, 4 }
  0x40   : > { %p1096_p5 = pnand %p655_p9, %p187_p12  ;;  %s176_s18 = sadd.s32 %s653_s17, %s652_s8 }
  0x41   : > { %s170_s23 = scalar_lea.vmem [#allocation5], %s651_s5  ;;  %s654_s20 = sshll.u32 %s176_s18, 7 }
  0x42   : > { %s179_s0 = sshll.u32 %s170_s23, 4  ;;  %s1107_s7 = scalar_lea.hbm %s1326_s1, %s654_s20  ;;  %s1102_s0 = int_to_ptr.vmem [resolvable:$true] %s179_s0 }
  0x43   : > { %s167_s22 = scalar_lea.sflag [#allocation6], %s1043_s29  ;;  %s799_s26 = scalar_lea.hbm %s1107_s7, 1024 }
  0x44   : > { %p800_p10 = scmp.ne.s32.totalorder %s1107_s7, %s799_s26  ;;  %s804_s5 = scalar_lea.hbm %s1326_s1, 4096 }
  0x45   : > { %p805_p1 = scmp.lt.u32.totalorder %s1107_s7, %s1326_s1  ;;  %p806_p4 = scmp.lt.u32.totalorder %s804_s5, %s799_s26 }
  0x46   : > { %p802_p11 = pnand %p800_p10, %p771_p2  ;;  %p808_p6 = scmp.lt.u32.totalorder %s799_s26, %s1107_s7 }
  0x47   : > { %p807_p3 = por %p806_p4, %p805_p1 }
  0x48   : > { %p803_p13 = pneg %p802_p11 }
  0x49   : > { %p809_p7 = por %p808_p6, %p807_p3 }
  0x4b   : > { %p810_p9 = pnand %p809_p7, %p803_p13 }
  0x4d   : > { %813 = shalt.err (!%p810_p9)
}
  0x4e   : > { %s814_s19 = scalar_lea.vmem %s1102_s0, 1024  ;;  %s937_s20 = smov [#allocation5]  }
  0x4f   : > { %p815_p12 = scmp.ne.s32.totalorder %s1102_s0, %s814_s19  ;;  %s819_s30 = sshll.u32 %s937_s20, 4  ;;  %s820_s30 = int_to_ptr.vmem [resolvable:$false] %s819_s30 }
  0x50   : > { %s821_s18 = scalar_lea.vmem %s820_s30, 2048  ;;  %p822_p8 = scmp.lt.s32.totalorder %s1102_s0, %s820_s30 }
  0x51   : > { %p817_p10 = pnand %p815_p12, %p771_p2  ;;  %p823_p1 = scmp.lt.s32.totalorder %s821_s18, %s814_s19 }
  0x53   : > { %p818_p11 = pneg %p817_p10  ;;  %p824_p4 = por %p823_p1, %p822_p8 }
  0x55   : > { %p825_p3 = pnand %p824_p4, %p818_p11 }
  0x57   : > { %828 = shalt.err (!%p825_p3)
}
  0x58   : > { %s938_s23 = smov 512   ;;  %s939_s26 = smov 16  }
  0x59   : > { %683 = dma.hbm_to_vmem [thread:$0]  (!%p1060_p0), %s1107_s7, 1024, %s1102_s0, %s167_s22, %s938_s23, %s934_s27, %s939_s26  }
  0x5a   : > { %191 = sbr.rel (%p1096_p5) target bundleno = 348 (0x15c), region = 28  ;;  %s1139_s3 = sand.u32 (!%p1096_p5), 1, %s907_s10  }
  0x5b   : > { %s656_s4 = sshll.u32 (!%p1096_p5), %s1139_s3, 5  ;;  %s194_s5 = scalar_lea.sflag (!%p1096_p5), [#allocation3], %s1139_s3 }
  0x5c   : > { %s197_s8 = scalar_lea.vmem (!%p1096_p5), [#allocation2], %s656_s4  ;;  %p1343_p8 = scmp.ne.s32.totalorder (!%p1096_p5), %s1336_s24, 0 }
  0x61   : > { %890 = dma.done.wait (%p1343_p8), %s194_s5, 512  }
  0x62   : > { %892 = vsyncadd (%p1343_p8), %s194_s5, 4294966784  ;;  %s657_s0 = sshll.u32 %s1139_s3, 6  ;;  %s203_s29 = scalar_lea.sflag [#allocation6], %s1139_s3 }
  0x63   : > { %s206_s21 = scalar_lea.vmem [#allocation5], %s657_s0 }
  0x64   : > { %894 = dma.done.wait (%p1343_p8), %s203_s29, 1024  }
  0x65   : > { %896 = vsyncadd (%p1343_p8), %s203_s29, 4294966272  ;;  %v239_v0 = vld [vmem:[%s206_s21 + $0x10] sm:$0xff]  ;;  %v237_v1 = vld [vmem:[%s206_s21] sm:$0xff]  ;;  %s940_s27 = smov 1   ;;  %s1177_s24 = scalar_lea.vmem [#allocation7], %s657_s0  ;;  %vm278_vm0 = vcmask 7168  }
  0x66   : > { %266 = vrot.lane.b32.xlu1 %v239_v0, %s940_s27  ;;  %262 = vrot.lane.b32.xlu0 %v237_v1, %s940_s27  ;;  %v240_v2 = vld [vmem:[%s206_s21 + $0x18] sm:$0xff]  ;;  %v238_v3 = vld [vmem:[%s206_s21 + $0x8] sm:$0xff]  ;;  %s941_s6 = smov 2   ;;  %s942_s7 = smov 3   ;;  %vm313_vm1 = vcmask 15360   ;;  %vm348_vm2 = vcmask 23552  }
  0x67   : > { %v1155_v4 = vld [vmem:[%s206_s21 + $0x28] sm:$0xff]  ;;  %v1159_v6 = vld [vmem:[%s197_s8] sm:$0xff]  ;;  %v1161_v7 = vld [vmem:[%s197_s8 + $0x10] sm:$0xff]  ;;  %s943_s22 = smov 4   ;;  %s944_s17 = smov 5   ;;  %vm383_vm3 = vcmask 31744  }
  0x68   : > { %v1157_v5 = vld [vmem:[%s197_s8 + $0x8] sm:$0xff]  ;;  %v245_v9 = vmul.f32 %v238_v3, %v1159_v6  ;;  %v247_v10 = vmul.f32 %v1155_v4, %v1161_v7  ;;  %v1167_v11 = vld [vmem:[%s206_s21 + $0x38] sm:$0xff]  ;;  %v241_v13 = vld [vmem:[%s206_s21 + $0x20] sm:$0xff]  ;;  %s945_s19 = smov 6   ;;  %s946_s20 = smov 7   ;;  %vm418_vm4 = vcmask 39936  }
  0x69   : > { %v246_v8 = vmul.f32 %v240_v2, %v1157_v5  ;;  %v1169_v12 = vld [vmem:[%s197_s8 + $0x18] sm:$0xff]  ;;  %v243_v17 = vld [vmem:[%s206_s21 + $0x30] sm:$0xff]  ;;  %vm453_vm5 = vcmask 48128   ;;  %vm488_vm6 = vcmask 56320   ;;  %s667_s30 = sshll.u32 %s919_s13, 4  ;;  %s525_s13 = sshll.u32 %s1177_s24, 4  ;;  %s1264_s13 = int_to_ptr.vmem [resolvable:$true] %s525_s13 }
  0x6a   : > { %268 = vrot.lane.b32.xlu1 %v240_v2, %s940_s27  ;;  %264 = vrot.lane.b32.xlu0 %v238_v3, %s940_s27  ;;  %v248_v15 = vmul.f32 %v1167_v11, %v1169_v12  ;;  %s522_s18 = sadd.s32 %s915_s12, %s667_s30  ;;  %s508_s5 = scalar_lea.sflag [#allocation4], %s1139_s3 }
  0x6b   : > { %v249_v14 = vadd.f32 %v246_v8, %v245_v9  ;;  %s668_s23 = sshll.u32 %s522_s18, 7  ;;  %s829_s8 = scalar_lea.vmem %s1264_s13, 1024 }
  0x6c   : > { %s1270_s4 = scalar_lea.hbm %s1327_s2, %s668_s23  ;;  %p830_p0 = scmp.ne.s32.totalorder %s1264_s13, %s829_s8 }
  0x6d   : > { %v250_v16 = vadd.f32 %v249_v14, %v247_v10  ;;  %p1344_p2 = scmp.ne.s32.totalorder %s1337_s25, 0  ;;  %s947_s0 = smov [#allocation7]  }
  0x6e   : > { %272 = vrot.lane.b32.xlu1 %v1155_v4, %s940_s27  ;;  %270 = vrot.lane.b32.xlu0 %v241_v13, %s940_s27  ;;  %s833_s29 = sshll.u32 %s947_s0, 4  ;;  %s834_s29 = int_to_ptr.vmem [resolvable:$false] %s833_s29 }
  0x6f   : > { %v251_v18 = vadd.f32 %v250_v16, %v248_v15  ;;  %p831_p5 = pnand %p830_p0, %p1344_p2  ;;  %s835_s21 = scalar_lea.vmem %s834_s29, 2048 }
  0x70   : > { %p836_p6 = scmp.lt.s32.totalorder %s1264_s13, %s834_s29  ;;  %p837_p7 = scmp.lt.s32.totalorder %s835_s21, %s829_s8 }
  0x71   : > { %v252_v19 = vmul.f32 0.25, %v251_v18  ;;  %p832_p13 = pneg %p831_p5 }
  0x72   : > { %276 = vrot.lane.b32.xlu1 %v1167_v11, %s940_s27  ;;  %274 = vrot.lane.b32.xlu0 %v243_v17, %s940_s27  ;;  %p838_p9 = por %p837_p7, %p836_p6 }
  0x73   : > { %253 = vst [vmem:[%s1177_s24] sm:$0xff] %v252_v19 }
  0x74   : > { %p839_p12 = pnand %p838_p9, %p832_p13 }
  0x76   : > { %299 = vrot.lane.b32.xlu1 %v238_v3, %s941_s6  ;;  %297 = vrot.lane.b32.xlu0 %v237_v1, %s941_s6 }
  0x7a   : > { %303 = vrot.lane.b32.xlu1 %v240_v2, %s941_s6  ;;  %301 = vrot.lane.b32.xlu0 %v239_v0, %s941_s6 }
  0x7e   : > { %307 = vrot.lane.b32.xlu1 %v1155_v4, %s941_s6  ;;  %305 = vrot.lane.b32.xlu0 %v241_v13, %s941_s6 }
  0x82   : > { %311 = vrot.lane.b32.xlu1 %v1167_v11, %s941_s6  ;;  %309 = vrot.lane.b32.xlu0 %v243_v17, %s941_s6 }
  0x86   : > { %334 = vrot.lane.b32.xlu1 %v238_v3, %s942_s7  ;;  %332 = vrot.lane.b32.xlu0 %v237_v1, %s942_s7 }
  0x8a   : > { %338 = vrot.lane.b32.xlu1 %v240_v2, %s942_s7  ;;  %336 = vrot.lane.b32.xlu0 %v239_v0, %s942_s7 }
  0x8e   : > { %367 = vrot.lane.b32.xlu1 %v237_v1, %s943_s22  ;;  %340 = vrot.lane.b32.xlu0 %v241_v13, %s942_s7 }
  0x92   : > { %371 = vrot.lane.b32.xlu1 %v239_v0, %s943_s22  ;;  %369 = vrot.lane.b32.xlu0 %v238_v3, %s943_s22 }
  0x96   : > { %402 = vrot.lane.b32.xlu1 %v237_v1, %s944_s17  ;;  %373 = vrot.lane.b32.xlu0 %v240_v2, %s943_s22 }
  0x9a   : > { %406 = vrot.lane.b32.xlu1 %v239_v0, %s944_s17  ;;  %404 = vrot.lane.b32.xlu0 %v238_v3, %s944_s17 }
  0x9e   : > { %437 = vrot.lane.b32.xlu1 %v237_v1, %s945_s19  ;;  %408 = vrot.lane.b32.xlu0 %v240_v2, %s944_s17 }
  0xa2   : > { %441 = vrot.lane.b32.xlu1 %v239_v0, %s945_s19  ;;  %439 = vrot.lane.b32.xlu0 %v238_v3, %s945_s19 }
  0xa6   : > { %472 = vrot.lane.b32.xlu1 %v237_v1, %s946_s20  ;;  %443 = vrot.lane.b32.xlu0 %v240_v2, %s945_s19 }
  0xaa   : > { %476 = vrot.lane.b32.xlu1 %v239_v0, %s946_s20  ;;  %474 = vrot.lane.b32.xlu0 %v238_v3, %s946_s20 }
  0xae   : > { %342 = vrot.lane.b32.xlu1 %v1155_v4, %s942_s7  ;;  %478 = vrot.lane.b32.xlu0 %v240_v2, %s946_s20 }
  0xb2   : > { %377 = vrot.lane.b32.xlu1 %v1155_v4, %s943_s22  ;;  %375 = vrot.lane.b32.xlu0 %v241_v13, %s943_s22 }
  0xb6   : > { %412 = vrot.lane.b32.xlu1 %v1155_v4, %s944_s17  ;;  %410 = vrot.lane.b32.xlu0 %v241_v13, %s944_s17 }
  0xba   : > { %447 = vrot.lane.b32.xlu1 %v1155_v4, %s945_s19  ;;  %445 = vrot.lane.b32.xlu0 %v241_v13, %s945_s19 }
  0xbe   : > { %482 = vrot.lane.b32.xlu1 %v1155_v4, %s946_s20  ;;  %480 = vrot.lane.b32.xlu0 %v241_v13, %s946_s20 }
  0xc2   : > { %346 = vrot.lane.b32.xlu1 %v1167_v11, %s942_s7  ;;  %344 = vrot.lane.b32.xlu0 %v243_v17, %s942_s7 }
  0xc6   : > { %381 = vrot.lane.b32.xlu1 %v1167_v11, %s943_s22  ;;  %379 = vrot.lane.b32.xlu0 %v243_v17, %s943_s22 }
  0xca   : > { %416 = vrot.lane.b32.xlu1 %v1167_v11, %s944_s17  ;;  %414 = vrot.lane.b32.xlu0 %v243_v17, %s944_s17 }
  0xce   : > { %451 = vrot.lane.b32.xlu1 %v1167_v11, %s945_s19  ;;  %449 = vrot.lane.b32.xlu0 %v243_v17, %s945_s19 }
  0xd2   : > { %486 = vrot.lane.b32.xlu1 %v1167_v11, %s946_s20  ;;  %484 = vrot.lane.b32.xlu0 %v243_v17, %s946_s20 }
  0xd8   : > { %v267_v20 = vpop.permute.xlu1 %266  ;;  %v263_v21 = vpop.permute.xlu0 %262 }
  0xdc   : > { %v269_v22 = vpop.permute.xlu1 %268  ;;  %v265_v23 = vpop.permute.xlu0 %264 }
  0xdd   : > { %v280_v24 = vsel %vm278_vm0, %v267_v20, %v269_v22  ;;  %v279_v25 = vsel %vm278_vm0, %v263_v21, %v265_v23 }
  0xde   : > { %v288_v26 = vmul.f32 %v280_v24, %v1157_v5  ;;  %v287_v27 = vmul.f32 %v279_v25, %v1159_v6 }
  0xe0   : > { %v273_v28 = vpop.permute.xlu1 %272  ;;  %v271_v29 = vpop.permute.xlu0 %270  ;;  %v291_v32 = vadd.f32 %v288_v26, %v287_v27 }
  0xe1   : > { %v281_v30 = vsel %vm278_vm0, %v271_v29, %v273_v28 }
  0xe2   : > { %v289_v31 = vmul.f32 %v281_v30, %v1161_v7 }
  0xe4   : > { %v277_v33 = vpop.permute.xlu1 %276  ;;  %v275_v34 = vpop.permute.xlu0 %274  ;;  %v292_v36 = vadd.f32 %v291_v32, %v289_v31 }
  0xe5   : > { %v282_v35 = vsel %vm278_vm0, %v275_v34, %v277_v33 }
  0xe6   : > { %v290_v37 = vmul.f32 %v282_v35, %v1169_v12 }
  0xe8   : > { %v293_v38 = vadd.f32 %v292_v36, %v290_v37  ;;  %v300_v39 = vpop.permute.xlu1 %299  ;;  %v298_v40 = vpop.permute.xlu0 %297 }
  0xe9   : > { %v314_v45 = vsel %vm313_vm1, %v298_v40, %v300_v39 }
  0xea   : > { %v294_v41 = vmul.f32 0.25, %v293_v38  ;;  %v322_v50 = vmul.f32 %v314_v45, %v1159_v6 }
  0xec   : > { %659 = vst [vmem:[%s1177_s24 + $0x8] sm:$0xff] %v294_v41  ;;  %v304_v42 = vpop.permute.xlu1 %303  ;;  %v302_v43 = vpop.permute.xlu0 %301 }
  0xed   : > { %v315_v44 = vsel %vm313_vm1, %v302_v43, %v304_v42 }
  0xee   : > { %v323_v46 = vmul.f32 %v315_v44, %v1157_v5 }
  0xf0   : > { %v308_v47 = vpop.permute.xlu1 %307  ;;  %v306_v48 = vpop.permute.xlu0 %305  ;;  %v326_v52 = vadd.f32 %v323_v46, %v322_v50 }
  0xf1   : > { %v316_v49 = vsel %vm313_vm1, %v306_v48, %v308_v47 }
  0xf2   : > { %v324_v51 = vmul.f32 %v316_v49, %v1161_v7 }
  0xf4   : > { %v312_v53 = vpop.permute.xlu1 %311  ;;  %v310_v54 = vpop.permute.xlu0 %309  ;;  %v327_v56 = vadd.f32 %v326_v52, %v324_v51 }
  0xf5   : > { %v317_v55 = vsel %vm313_vm1, %v310_v54, %v312_v53 }
  0xf6   : > { %v325_v57 = vmul.f32 %v317_v55, %v1169_v12 }
  0xf8   : > { %v328_v58 = vadd.f32 %v327_v56, %v325_v57  ;;  %v335_v59 = vpop.permute.xlu1 %334  ;;  %v333_v60 = vpop.permute.xlu0 %332 }
  0xf9   : > { %v349_v29 = vsel %vm348_vm2, %v333_v60, %v335_v59 }
  0xfa   : > { %v329_v61 = vmul.f32 0.25, %v328_v58  ;;  %v357_v35 = vmul.f32 %v349_v29, %v1159_v6 }
  0xfc   : > { %660 = vst [vmem:[%s1177_s24 + $0x10] sm:$0xff] %v329_v61  ;;  %v339_v62 = vpop.permute.xlu1 %338  ;;  %v337_v63 = vpop.permute.xlu0 %336 }
  0xfd   : > { %v350_v28 = vsel %vm348_vm2, %v337_v63, %v339_v62 }
  0xfe   : > { %v358_v31 = vmul.f32 %v350_v28, %v1157_v5 }
 0x100   : > { %v368_v0 = vpop.permute.xlu1 %367  ;;  %v341_v1 = vpop.permute.xlu0 %340  ;;  %v361_v39 = vadd.f32 %v358_v31, %v357_v35 }
 0x104   : > { %v372_v2 = vpop.permute.xlu1 %371  ;;  %v370_v3 = vpop.permute.xlu0 %369 }
 0x105   : > { %v384_v36 = vsel %vm383_vm3, %v368_v0, %v370_v3 }
 0x106   : > { %v392_v43 = vmul.f32 %v384_v36, %v1159_v6 }
 0x108   : > { %v403_v4 = vpop.permute.xlu1 %402  ;;  %v374_v8 = vpop.permute.xlu0 %373 }
 0x109   : > { %v385_v34 = vsel %vm383_vm3, %v372_v2, %v374_v8 }
 0x10a   : > { %v393_v40 = vmul.f32 %v385_v34, %v1157_v5 }
 0x10c   : > { %v407_v9 = vpop.permute.xlu1 %406  ;;  %v405_v10 = vpop.permute.xlu0 %404  ;;  %v396_v51 = vadd.f32 %v393_v40, %v392_v43 }
 0x10d   : > { %v419_v46 = vsel %vm418_vm4, %v403_v4, %v405_v10 }
 0x10e   : > { %v427_v56 = vmul.f32 %v419_v46, %v1159_v6 }
 0x110   : > { %v438_v11 = vpop.permute.xlu1 %437  ;;  %v409_v13 = vpop.permute.xlu0 %408 }
 0x111   : > { %v420_v44 = vsel %vm418_vm4, %v407_v9, %v409_v13 }
 0x112   : > { %v428_v52 = vmul.f32 %v420_v44, %v1157_v5 }
 0x114   : > { %v442_v14 = vpop.permute.xlu1 %441  ;;  %v440_v15 = vpop.permute.xlu0 %439 }
 0x115   : > { %v454_v57 = vsel %vm453_vm5, %v438_v11, %v440_v15 }
 0x116   : > { %v462_v9 = vmul.f32 %v454_v57, %v1159_v6 }
 0x118   : > { %v473_v16 = vpop.permute.xlu1 %472  ;;  %v444_v17 = vpop.permute.xlu0 %443 }
 0x119   : > { %v455_v58 = vsel %vm453_vm5, %v442_v14, %v444_v17 }
 0x11a   : > { %v463_v2 = vmul.f32 %v455_v58, %v1157_v5 }
 0x11c   : > { %v477_v18 = vpop.permute.xlu1 %476  ;;  %v475_v19 = vpop.permute.xlu0 %474 }
 0x11d   : > { %v489_v10 = vsel %vm488_vm6, %v473_v16, %v475_v19 }
 0x11e   : > { %v497_v19 = vmul.f32 %v489_v10, %v1159_v6 }
 0x120   : > { %v343_v20 = vpop.permute.xlu1 %342  ;;  %v479_v21 = vpop.permute.xlu0 %478 }
 0x121   : > { %v351_v30 = vsel %vm348_vm2, %v341_v1, %v343_v20  ;;  %v431_v1 = vadd.f32 %v428_v52, %v427_v56  ;;  %v490_v11 = vsel %vm488_vm6, %v477_v18, %v479_v21 }
 0x122   : > { %v359_v37 = vmul.f32 %v351_v30, %v1161_v7 }
 0x124   : > { %v378_v22 = vpop.permute.xlu1 %377  ;;  %v376_v23 = vpop.permute.xlu0 %375  ;;  %v362_v47 = vadd.f32 %v361_v39, %v359_v37 }
 0x125   : > { %v386_v38 = vsel %vm383_vm3, %v376_v23, %v378_v22  ;;  %v466_v23 = vadd.f32 %v463_v2, %v462_v9 }
 0x126   : > { %v394_v48 = vmul.f32 %v386_v38, %v1161_v7 }
 0x128   : > { %v413_v24 = vpop.permute.xlu1 %412  ;;  %v411_v25 = vpop.permute.xlu0 %410  ;;  %v397_v60 = vadd.f32 %v396_v51, %v394_v48 }
 0x129   : > { %v421_v50 = vsel %vm418_vm4, %v411_v25, %v413_v24  ;;  %v498_v24 = vmul.f32 %v490_v11, %v1157_v5 }
 0x12a   : > { %v429_v61 = vmul.f32 %v421_v50, %v1161_v7 }
 0x12b   : > { %v501_v30 = vadd.f32 %v498_v24, %v497_v19 }
 0x12c   : > { %v448_v26 = vpop.permute.xlu1 %447  ;;  %v446_v27 = vpop.permute.xlu0 %445  ;;  %v432_v14 = vadd.f32 %v431_v1, %v429_v61 }
 0x12d   : > { %v456_v0 = vsel %vm453_vm5, %v446_v27, %v448_v26 }
 0x12e   : > { %v464_v15 = vmul.f32 %v456_v0, %v1161_v7 }
 0x130   : > { %v483_v32 = vpop.permute.xlu1 %482  ;;  %v481_v33 = vpop.permute.xlu0 %480  ;;  %v467_v26 = vadd.f32 %v466_v23, %v464_v15 }
 0x131   : > { %v491_v22 = vsel %vm488_vm6, %v481_v33, %v483_v32 }
 0x132   : > { %v499_v27 = vmul.f32 %v491_v22, %v1161_v7 }
 0x134   : > { %v347_v41 = vpop.permute.xlu1 %346  ;;  %v345_v42 = vpop.permute.xlu0 %344  ;;  %v502_v33 = vadd.f32 %v501_v30, %v499_v27 }
 0x135   : > { %v352_v45 = vsel %vm348_vm2, %v345_v42, %v347_v41 }
 0x136   : > { %v360_v49 = vmul.f32 %v352_v45, %v1169_v12 }
 0x138   : > { %v363_v53 = vadd.f32 %v362_v47, %v360_v49  ;;  %v382_v54 = vpop.permute.xlu1 %381  ;;  %v380_v55 = vpop.permute.xlu0 %379 }
 0x139   : > { %v387_v59 = vsel %vm383_vm3, %v380_v55, %v382_v54 }
 0x13a   : > { %v364_v62 = vmul.f32 0.25, %v363_v53  ;;  %v395_v63 = vmul.f32 %v387_v59, %v1169_v12 }
 0x13c   : > { %661 = vst [vmem:[%s1177_s24 + $0x18] sm:$0xff] %v364_v62  ;;  %v398_v3 = vadd.f32 %v397_v60, %v395_v63  ;;  %v417_v4 = vpop.permute.xlu1 %416  ;;  %v415_v8 = vpop.permute.xlu0 %414 }
 0x13d   : > { %v422_v13 = vsel %vm418_vm4, %v415_v8, %v417_v4 }
 0x13e   : > { %v399_v17 = vmul.f32 0.25, %v398_v3  ;;  %v430_v20 = vmul.f32 %v422_v13, %v1169_v12 }
 0x140   : > { %662 = vst [vmem:[%s1177_s24 + $0x20] sm:$0xff] %v399_v17  ;;  %v433_v25 = vadd.f32 %v432_v14, %v430_v20  ;;  %v452_v16 = vpop.permute.xlu1 %451  ;;  %v450_v18 = vpop.permute.xlu0 %449 }
 0x141   : > { %v457_v21 = vsel %vm453_vm5, %v450_v18, %v452_v16 }
 0x142   : > { %v434_v28 = vmul.f32 0.25, %v433_v25  ;;  %v465_v29 = vmul.f32 %v457_v21, %v1169_v12 }
 0x144   : > { %663 = vst [vmem:[%s1177_s24 + $0x28] sm:$0xff] %v434_v28  ;;  %v468_v5 = vadd.f32 %v467_v26, %v465_v29  ;;  %v487_v31 = vpop.permute.xlu1 %486  ;;  %v485_v32 = vpop.permute.xlu0 %484 }
 0x145   : > { %v492_v6 = vsel %vm488_vm6, %v485_v32, %v487_v31 }
 0x146   : > { %v469_v34 = vmul.f32 0.25, %v468_v5  ;;  %v500_v7 = vmul.f32 %v492_v6, %v1169_v12 }
 0x148   : > { %664 = vst [vmem:[%s1177_s24 + $0x30] sm:$0xff] %v469_v34  ;;  %v503_v35 = vadd.f32 %v502_v33, %v500_v7 }
 0x14a   : > { %v504_v36 = vmul.f32 0.25, %v503_v35 }
 0x14c   : > { %665 = vst [vmem:[%s1177_s24 + $0x38] sm:$0xff] %v504_v36 }
 0x14d   : > { %842 = shalt.err (!%p839_p12)
}
 0x14e   : > { %s843_s27 = scalar_lea.hbm %s1270_s4, 1024  ;;  %s847_s7 = scalar_lea.hbm %s1327_s2, 4096 }
 0x14f   : > { %p844_p10 = scmp.ne.s32.totalorder %s1270_s4, %s843_s27  ;;  %p848_p4 = scmp.lt.u32.totalorder %s1270_s4, %s1327_s2 }
 0x150   : > { %p849_p3 = scmp.lt.u32.totalorder %s847_s7, %s843_s27  ;;  %p851_p0 = scmp.lt.u32.totalorder %s843_s27, %s1270_s4 }
 0x151   : > { %p845_p11 = pnand %p844_p10, %p1344_p2 }
 0x152   : > { %p850_p8 = por %p849_p3, %p848_p4 }
 0x153   : > { %p846_p1 = pneg %p845_p11 }
 0x154   : > { %p852_p5 = por %p851_p0, %p850_p8 }
 0x156   : > { %p853_p13 = pnand %p852_p5, %p846_p1 }
 0x158   : > { %856 = shalt.err (!%p853_p13)
}
 0x159   : > { %s948_s19 = smov 128   ;;  %s949_s20 = smov 256  }
 0x15a   : > { %s950_s30 = smov 8  }
 0x15b   : > { %675 = dma.vmem_to_hbm [thread:$0]  (%p1344_p2), %s1264_s13, 1024, %s1270_s4, %s508_s5, %s948_s19, %s949_s20, %s950_s30  }
 0x15c PF: > { %p689_p6 = scmp.ge.s32.totalorder %s931_s16, 2  ;;  %s540_s18 = sand.u32 1, %s903_s9  }
 0x15d   : > { %p1345_p7 = scmp.ne.s32.totalorder %s1338_s28, 0  ;;  %s541_s23 = scalar_lea.sflag [#allocation4], %s540_s18 }
 0x15f   : > { %p685_p9 = pnand %p689_p6, %p1345_p7 }
 0x161   : > { %898 = dma.done.wait (!%p685_p9), %s541_s23, 1024  }
 0x162   : > { %900 = vsyncadd (!%p685_p9), %s541_s23, 4294966272  ;;  %s21_s16 = sadd.s32 1, %s931_s16   ;;  %s1346_s12 = sld [smem:[#allocation13_spill]] }
 0x163   : > { %p18_p12 = scmp.ge.s32.totalorder %s21_s16, 6   ;;  %s1347_s25 = sld [smem:[#allocation11_spill]] }
 0x164   : > { %s1348_s3 = sld [smem:[#allocation12_spill]]  ;;  %s1349_s9 = smov %s907_s10 }
 0x165   : > { %s1350_s10 = smov %s911_s11  ;;  %s1353_s13 = smov %s927_s15 }
 0x166   :  { %20 = sbr.rel (!%p18_p12) target bundleno = 11 (0xb), region = 93 }
 0x168   : > { %s1351_s11 = smov %s1346_s12  ;;  %s1352_s12 = smov %s923_s14 }
 0x169   : > { %s1354_s14 = smov %s1347_s25 }
 0x16a   : > { %s1355_s15 = smov %s1348_s3 }
 0x16d   :  { %546 = vsyncpa [#allocation3], 1 }
 0x16e   :  { %548 = vsyncpa [#allocation3 + $0x1], 1 }
 0x16f   :  { %549 = vsyncpa [#allocation6], 1 }
 0x170   :  { %551 = vsyncpa [#allocation6 + $0x1], 1 }
 0x171   :  { %552 = vsyncpa [#allocation4], 1 }
 0x172   :  { %554 = vsyncpa [#allocation4 + $0x1], 1 }

</bundles_post_ra>
